<compile_context>
chip_gen: v5e
topology: v5e:2x2
jax: 0.10.0
libtpu: 0.0.40
codegen_flags: <defaults>
</compile_context>

<pallas_src>
import functools

import jax
import jax.numpy as jnp
from jax.experimental import pallas as pl
from jax.experimental.pallas import tpu as pltpu


# --------------------------------------------------------------------------- kernels
def _encoder_kernel(x_ref, w1_ref, b1_ref, w2_ref, b2_ref, w3_ref, b3_ref, o_ref):
    """3-layer MLP on one batch tile.  MXU operands in the weights' dtype (bf16),
    accumulation / bias / ReLU in f32."""
    cdt = w1_ref.dtype                                # MXU operand dtype (bf16)
    x = x_ref[...].astype(cdt)

    h = jnp.dot(x, w1_ref[...], preferred_element_type=jnp.float32) + b1_ref[...]
    h = jnp.maximum(h, 0.0)                           # .clamp(min=0), f32 on the VPU

    h = jnp.dot(h.astype(cdt), w2_ref[...], preferred_element_type=jnp.float32) + b2_ref[...]
    h = jnp.maximum(h, 0.0)

    y = jnp.dot(h.astype(cdt), w3_ref[...], preferred_element_type=jnp.float32) + b3_ref[...]
    o_ref[...] = y.astype(o_ref.dtype)


def _logits_kernel(za_ref, zp_ref, w_ref, o_ref):
    """logits = z_a @ W @ z_pos.T, then subtract the per-row max (all in VMEM)."""
    cdt = w_ref.dtype                                 # bf16 MXU operands, f32 accumulate
    za = za_ref[...].astype(cdt)                      # (B, Fp)
    zp = zp_ref[...].astype(cdt)                      # (B, Fp)

    zaw = jnp.dot(za, w_ref[...], preferred_element_type=jnp.float32)       # (B, Fp)
    logits = jnp.einsum("qf,bf->qb", zaw.astype(cdt), zp,
                        preferred_element_type=jnp.float32)                 # (B, B)
    logits = logits - jnp.max(logits, axis=1, keepdims=True)
    o_ref[...] = logits.astype(o_ref.dtype)


# --------------------------------------------------------------------------- wrapper
def _round_up(x, m):
    return ((x + m - 1) // m) * m


def _pad2d(a, rows=None, cols=None):
    r, c = a.shape
    pr = (rows - r) if rows is not None else 0
    pc = (cols - c) if cols is not None else 0
    if pr == 0 and pc == 0:
        return a
    return jnp.pad(a, ((0, pr), (0, pc)))


@functools.partial(jax.jit, static_argnames=("block_rows",))
def contrastive_future_state_forward(s_0, s_h, params, block_rows=256):
    """Pallas implementation of ContrastiveFutureState.forward(s_0, s_h) -> logits (B, B)."""
    B, S = s_0.shape
    H = params["w1"].shape[1]
    F = params["w3"].shape[1]
    Fp = _round_up(F, 128)          # lane-dense encoder output (full vst, not vst.msk)

    # ---------------- encoder: one call over the stacked [s_0; s_h] batch ----------------
    x = jnp.concatenate([s_0, s_h], axis=0)           # (2B, S)
    rows = 2 * B
    if rows <= block_rows:                            # tiny batch: single grid step
        rows_pad = _round_up(rows, 8)
        blk = rows_pad
    else:                                             # large batch: 256-row MXU tiles
        blk = block_rows
        rows_pad = _round_up(rows, blk)
    x = _pad2d(x, rows=rows_pad)

    # bf16 MXU operands (halves weight DMA); biases stay f32 and broadcast in-kernel.
    w1 = params["w1"].astype(jnp.bfloat16)
    w2 = params["w2"].astype(jnp.bfloat16)
    w3 = _pad2d(params["w3"], cols=Fp).astype(jnp.bfloat16)   # zero-pad feature cols to 128
    b1 = params["b1"]
    b2 = params["b2"]
    b3 = _pad2d(params["b3"], cols=Fp)

    batch_map = lambda i: (i, 0)
    const_map = lambda i: (0, 0)

    z = pl.pallas_call(
        _encoder_kernel,
        out_shape=jax.ShapeDtypeStruct((rows_pad, Fp), jnp.float32),
        grid=(rows_pad // blk,),
        in_specs=[
            pl.BlockSpec((blk, S), batch_map),   # x tile
            pl.BlockSpec((S, H), const_map),     # W1 (constant index map -> fetched once)
            pl.BlockSpec((1, H), const_map),     # b1
            pl.BlockSpec((H, H), const_map),     # W2
            pl.BlockSpec((1, H), const_map),     # b2
            pl.BlockSpec((H, Fp), const_map),    # W3 (lane-padded)
            pl.BlockSpec((1, Fp), const_map),    # b3 (lane-padded)
        ],
        out_specs=pl.BlockSpec((blk, Fp), batch_map),
        compiler_params=pltpu.CompilerParams(
            dimension_semantics=("parallel",),   # lets v7x shard batch tiles over 2 TCs
        ),
    )(x, w1, b1, w2, b2, w3, b3)

    z_a = z[:B]                                  # (B, Fp)
    z_pos = z[B:2 * B]                           # (B, Fp)

    # ---------------- bilinear logits + row-max shift ----------------
    # W zero-padded to (Fp, Fp): the padded z columns contribute exactly 0 to the logits.
    W = _pad2d(params["W"], rows=Fp, cols=Fp).astype(jnp.bfloat16)

    logits = pl.pallas_call(
        _logits_kernel,
        out_shape=jax.ShapeDtypeStruct((B, B), jnp.float32),
        grid=(1,),
        in_specs=[
            pl.BlockSpec((B, Fp), const_map),
            pl.BlockSpec((B, Fp), const_map),
            pl.BlockSpec((Fp, Fp), const_map),
        ],
        out_specs=pl.BlockSpec((B, B), const_map),
    )(z_a, z_pos, W)
    return logits


# --------------------------------------------------------------------------- init & reference
def init_params(key, state_dim, hidden_size=128, feature_size=32):
    """torch.nn.Linear-style init (uniform +/- 1/sqrt(fan_in)); W ~ torch.rand.
    Layer weights stored as (in, out) = PyTorch weight.T; biases as (1, out)."""
    ks = jax.random.split(key, 7)

    def lin(kw, kb, fan_in, fan_out):
        bound = fan_in ** -0.5
        w = jax.random.uniform(kw, (fan_in, fan_out), jnp.float32, -bound, bound)
        b = jax.random.uniform(kb, (1, fan_out), jnp.float32, -bound, bound)
        return w, b

    w1, b1 = lin(ks[0], ks[1], state_dim, hidden_size)
    w2, b2 = lin(ks[2], ks[3], hidden_size, hidden_size)
    w3, b3 = lin(ks[4], ks[5], hidden_size, feature_size)
    W = jax.random.uniform(ks[6], (feature_size, feature_size), jnp.float32)  # torch.rand
    return dict(w1=w1, b1=b1, w2=w2, b2=b2, w3=w3, b3=b3, W=W)


def reference_forward(s_0, s_h, params):
    """Pure-JAX reference applying the same bf16-operand / f32-accumulate policy as the
    kernels, so it can be compared at tight tolerance."""
    hi = jax.lax.Precision.HIGHEST

    def q(a):  # emulate the in-kernel bf16 cast of MXU operands
        return a.astype(jnp.bfloat16).astype(jnp.float32)

    def encode(x):
        h = jnp.maximum(jnp.dot(q(x), q(params["w1"]), precision=hi) + params["b1"], 0.0)
        h = jnp.maximum(jnp.dot(q(h), q(params["w2"]), precision=hi) + params["b2"], 0.0)
        return jnp.dot(q(h), q(params["w3"]), precision=hi) + params["b3"]

    z_a = encode(s_0)
    z_pos = encode(s_h)
    zaw = jnp.dot(q(z_a), q(params["W"]), precision=hi)
    logits = jnp.dot(q(zaw), q(z_pos).T, precision=hi)     # == z_a @ W @ z_pos.T
    return logits - jnp.max(logits, axis=1, keepdims=True)


# --------------------------------------------------------------------------- demo
if __name__ == "__main__":
    # Small shapes consistent with the module: batch=8, state_dimension=16,
    # hidden_size=128 (default), feature_size=32 (default).
    B, STATE_DIM, HIDDEN, FEAT = 8, 16, 128, 32

    key = jax.random.PRNGKey(0)
    k0, k1, kp = jax.random.split(key, 3)
    s_0 = jax.random.normal(k0, (B, STATE_DIM), jnp.float32)
    s_h = jax.random.normal(k1, (B, STATE_DIM), jnp.float32)
    params = init_params(kp, STATE_DIM, HIDDEN, FEAT)

    logits = contrastive_future_state_forward(s_0, s_h, params)
    logits = jax.block_until_ready(logits)

    ref = reference_forward(s_0, s_h, params)
    assert logits.shape == (B, B)
    # bf16-operand / f32-accumulate policy matched in the reference -> tight-ish tolerance.
    assert jnp.allclose(logits, ref, atol=2e-3, rtol=2e-3), \
        f"max abs err {float(jnp.max(jnp.abs(logits - ref)))}"
    # after the shift, every row's max must be exactly zero
    assert jnp.allclose(jnp.max(logits, axis=1), 0.0, atol=1e-6)

    print("KERNEL_OK")
</pallas_src>

<mosaic_0001>
module attributes {stable_mosaic.version = 11 : i64} {
  func.func @_encoder_kernel(%arg0: i32, %arg1: memref<16x16xf32, #tpu.memory_space<vmem>>, %arg2: memref<16x128xbf16, #tpu.memory_space<vmem>>, %arg3: memref<1x128xf32, #tpu.memory_space<vmem>>, %arg4: memref<128x128xbf16, #tpu.memory_space<vmem>>, %arg5: memref<1x128xf32, #tpu.memory_space<vmem>>, %arg6: memref<128x128xbf16, #tpu.memory_space<vmem>>, %arg7: memref<1x128xf32, #tpu.memory_space<vmem>>, %arg8: memref<16x128xf32, #tpu.memory_space<vmem>>) attributes {dimension_semantics = [#tpu.dimension_semantics<parallel>], iteration_bounds = array<i64: 1>, scalar_prefetch = 0 : i64, scratch_operands = 0 : i64, tpu.core_type = #tpu.core_type<tc>, window_params = [{transform_indices = @transform_0, window_bounds = array<i64: 16, 16>}, {pipeline_mode = #tpu.pipeline_mode<synchronous>, transform_indices = @transform_1, window_bounds = array<i64: 16, 128>}, {pipeline_mode = #tpu.pipeline_mode<synchronous>, transform_indices = @transform_2, window_bounds = array<i64: 1, 128>}, {pipeline_mode = #tpu.pipeline_mode<synchronous>, transform_indices = @transform_3, window_bounds = array<i64: 128, 128>}, {pipeline_mode = #tpu.pipeline_mode<synchronous>, transform_indices = @transform_4, window_bounds = array<i64: 1, 128>}, {pipeline_mode = #tpu.pipeline_mode<synchronous>, transform_indices = @transform_5, window_bounds = array<i64: 128, 128>}, {pipeline_mode = #tpu.pipeline_mode<synchronous>, transform_indices = @transform_6, window_bounds = array<i64: 1, 128>}, {transform_indices = @transform_7, window_bounds = array<i64: 16, 128>}]} {
    %c0 = arith.constant 0 : index
    %c0_0 = arith.constant 0 : index
    %0 = vector.load %arg1[%c0, %c0_0] : memref<16x16xf32, #tpu.memory_space<vmem>>, vector<16x16xf32>
    %1 = arith.truncf %0 : vector<16x16xf32> to vector<16x16xbf16>
    %c0_1 = arith.constant 0 : index
    %c0_2 = arith.constant 0 : index
    %2 = vector.load %arg2[%c0_1, %c0_2] : memref<16x128xbf16, #tpu.memory_space<vmem>>, vector<16x128xbf16>
    %cst = arith.constant dense<0.000000e+00> : vector<16x128xf32>
    %3 = tpu.matmul %1, %2, %cst {dimension_numbers = #tpu.dot_dimension_numbers<[1], [0], [0], [1], [0, 0, 1, 1], [], []>} : vector<16x16xbf16>, vector<16x128xbf16>, vector<16x128xf32> -> vector<16x128xf32>
    %c0_3 = arith.constant 0 : index
    %c0_4 = arith.constant 0 : index
    %4 = vector.load %arg3[%c0_3, %c0_4] : memref<1x128xf32, #tpu.memory_space<vmem>>, vector<1x128xf32>
    %5 = vector.broadcast %4 : vector<1x128xf32> to vector<16x128xf32>
    %6 = arith.addf %3, %5 : vector<16x128xf32>
    %cst_5 = arith.constant 0.000000e+00 : f32
    %7 = vector.broadcast %cst_5 : f32 to vector<16x128xf32>
    %8 = arith.maximumf %6, %7 : vector<16x128xf32>
    %9 = arith.truncf %8 : vector<16x128xf32> to vector<16x128xbf16>
    %c0_6 = arith.constant 0 : index
    %c0_7 = arith.constant 0 : index
    %10 = vector.load %arg4[%c0_6, %c0_7] : memref<128x128xbf16, #tpu.memory_space<vmem>>, vector<128x128xbf16>
    %cst_8 = arith.constant dense<0.000000e+00> : vector<16x128xf32>
    %11 = tpu.matmul %9, %10, %cst_8 {dimension_numbers = #tpu.dot_dimension_numbers<[1], [0], [0], [1], [0, 0, 1, 1], [], []>} : vector<16x128xbf16>, vector<128x128xbf16>, vector<16x128xf32> -> vector<16x128xf32>
    %c0_9 = arith.constant 0 : index
    %c0_10 = arith.constant 0 : index
    %12 = vector.load %arg5[%c0_9, %c0_10] : memref<1x128xf32, #tpu.memory_space<vmem>>, vector<1x128xf32>
    %13 = vector.broadcast %12 : vector<1x128xf32> to vector<16x128xf32>
    %14 = arith.addf %11, %13 : vector<16x128xf32>
    %cst_11 = arith.constant 0.000000e+00 : f32
    %15 = vector.broadcast %cst_11 : f32 to vector<16x128xf32>
    %16 = arith.maximumf %14, %15 : vector<16x128xf32>
    %17 = arith.truncf %16 : vector<16x128xf32> to vector<16x128xbf16>
    %c0_12 = arith.constant 0 : index
    %c0_13 = arith.constant 0 : index
    %18 = vector.load %arg6[%c0_12, %c0_13] : memref<128x128xbf16, #tpu.memory_space<vmem>>, vector<128x128xbf16>
    %cst_14 = arith.constant dense<0.000000e+00> : vector<16x128xf32>
    %19 = tpu.matmul %17, %18, %cst_14 {dimension_numbers = #tpu.dot_dimension_numbers<[1], [0], [0], [1], [0, 0, 1, 1], [], []>} : vector<16x128xbf16>, vector<128x128xbf16>, vector<16x128xf32> -> vector<16x128xf32>
    %c0_15 = arith.constant 0 : index
    %c0_16 = arith.constant 0 : index
    %20 = vector.load %arg7[%c0_15, %c0_16] : memref<1x128xf32, #tpu.memory_space<vmem>>, vector<1x128xf32>
    %21 = vector.broadcast %20 : vector<1x128xf32> to vector<16x128xf32>
    %22 = arith.addf %19, %21 : vector<16x128xf32>
    %c0_17 = arith.constant 0 : index
    %c0_18 = arith.constant 0 : index
    %23 = vector.load %arg8[%c0_17, %c0_18] : memref<16x128xf32, #tpu.memory_space<vmem>>, vector<16x128xf32>
    tpu.vector_store %arg8[%c0_17, %c0_18], %22 {strides = array<i32>} : memref<16x128xf32, #tpu.memory_space<vmem>>, vector<16x128xf32>,
    return
  }
  func.func @transform_0(%arg0: i32) -> (i32, i32) {
    %c0_i32 = arith.constant 0 : i32
    %c0_i32_0 = arith.constant 0 : i32
    return %arg0, %c0_i32 : i32, i32
  }
  func.func @transform_1(%arg0: i32) -> (i32, i32) {
    %c0_i32 = arith.constant 0 : i32
    %c0_i32_0 = arith.constant 0 : i32
    %c0_i32_1 = arith.constant 0 : i32
    return %c0_i32, %c0_i32_0 : i32, i32
  }
  func.func @transform_2(%arg0: i32) -> (i32, i32) {
    %c0_i32 = arith.constant 0 : i32
    %c0_i32_0 = arith.constant 0 : i32
    %c0_i32_1 = arith.constant 0 : i32
    return %c0_i32, %c0_i32_0 : i32, i32
  }
  func.func @transform_3(%arg0: i32) -> (i32, i32) {
    %c0_i32 = arith.constant 0 : i32
    %c0_i32_0 = arith.constant 0 : i32
    %c0_i32_1 = arith.constant 0 : i32
    return %c0_i32, %c0_i32_0 : i32, i32
  }
  func.func @transform_4(%arg0: i32) -> (i32, i32) {
    %c0_i32 = arith.constant 0 : i32
    %c0_i32_0 = arith.constant 0 : i32
    %c0_i32_1 = arith.constant 0 : i32
    return %c0_i32, %c0_i32_0 : i32, i32
  }
  func.func @transform_5(%arg0: i32) -> (i32, i32) {
    %c0_i32 = arith.constant 0 : i32
    %c0_i32_0 = arith.constant 0 : i32
    %c0_i32_1 = arith.constant 0 : i32
    return %c0_i32, %c0_i32_0 : i32, i32
  }
  func.func @transform_6(%arg0: i32) -> (i32, i32) {
    %c0_i32 = arith.constant 0 : i32
    %c0_i32_0 = arith.constant 0 : i32
    %c0_i32_1 = arith.constant 0 : i32
    return %c0_i32, %c0_i32_0 : i32, i32
  }
  func.func @transform_7(%arg0: i32) -> (i32, i32) {
    %c0_i32 = arith.constant 0 : i32
    %c0_i32_0 = arith.constant 0 : i32
    return %arg0, %c0_i32 : i32, i32
  }
}

module attributes {stable_mosaic.version = 11 : i64} {
  func.func @_logits_kernel(%arg0: i32, %arg1: memref<8x128xf32, #tpu.memory_space<vmem>>, %arg2: memref<8x128xf32, #tpu.memory_space<vmem>>, %arg3: memref<128x128xbf16, #tpu.memory_space<vmem>>, %arg4: memref<8x8xf32, #tpu.memory_space<vmem>>) attributes {dimension_semantics = [#tpu.dimension_semantics<arbitrary>], iteration_bounds = array<i64: 1>, scalar_prefetch = 0 : i64, scratch_operands = 0 : i64, tpu.core_type = #tpu.core_type<tc>, window_params = [{pipeline_mode = #tpu.pipeline_mode<synchronous>, transform_indices = @transform_0, window_bounds = array<i64: 8, 128>}, {pipeline_mode = #tpu.pipeline_mode<synchronous>, transform_indices = @transform_1, window_bounds = array<i64: 8, 128>}, {pipeline_mode = #tpu.pipeline_mode<synchronous>, transform_indices = @transform_2, window_bounds = array<i64: 128, 128>}, {pipeline_mode = #tpu.pipeline_mode<synchronous>, transform_indices = @transform_3, window_bounds = array<i64: 8, 8>}]} {
    %c0 = arith.constant 0 : index
    %c0_0 = arith.constant 0 : index
    %0 = vector.load %arg1[%c0, %c0_0] : memref<8x128xf32, #tpu.memory_space<vmem>>, vector<8x128xf32>
    %1 = arith.truncf %0 : vector<8x128xf32> to vector<8x128xbf16>
    %c0_1 = arith.constant 0 : index
    %c0_2 = arith.constant 0 : index
    %2 = vector.load %arg2[%c0_1, %c0_2] : memref<8x128xf32, #tpu.memory_space<vmem>>, vector<8x128xf32>
    %3 = arith.truncf %2 : vector<8x128xf32> to vector<8x128xbf16>
    %c0_3 = arith.constant 0 : index
    %c0_4 = arith.constant 0 : index
    %4 = vector.load %arg3[%c0_3, %c0_4] : memref<128x128xbf16, #tpu.memory_space<vmem>>, vector<128x128xbf16>
    %cst = arith.constant dense<0.000000e+00> : vector<8x128xf32>
    %5 = tpu.matmul %1, %4, %cst {dimension_numbers = #tpu.dot_dimension_numbers<[1], [0], [0], [1], [0, 0, 1, 1], [], []>} : vector<8x128xbf16>, vector<128x128xbf16>, vector<8x128xf32> -> vector<8x128xf32>
    %6 = arith.truncf %5 : vector<8x128xf32> to vector<8x128xbf16>
    "tpu.trace_start"() <{level = 10 : i32, message = "qf,bf->qb"}> : () -> ()
    %cst_5 = arith.constant dense<0.000000e+00> : vector<8x8xf32>
    %7 = tpu.matmul %6, %3, %cst_5 {dimension_numbers = #tpu.dot_dimension_numbers<[1], [1], [0], [0], [0, 0, 1, 0], [], []>} : vector<8x128xbf16>, vector<8x128xbf16>, vector<8x8xf32> -> vector<8x8xf32>
    "tpu.trace_stop"() : () -> ()
    %cst_6 = arith.constant dense<0xFF800000> : vector<8xf32>
    %8 = vector.multi_reduction <maximumf>, %7, %cst_6 [1] : vector<8x8xf32> to vector<8xf32>
    %9 = vector.shape_cast %8 : vector<8xf32> to vector<8x1xf32>
    %10 = vector.broadcast %9 : vector<8x1xf32> to vector<8x8xf32>
    %11 = arith.subf %7, %10 : vector<8x8xf32>
    %c0_7 = arith.constant 0 : index
    %c0_8 = arith.constant 0 : index
    %12 = vector.load %arg4[%c0_7, %c0_8] : memref<8x8xf32, #tpu.memory_space<vmem>>, vector<8x8xf32>
    tpu.vector_store %arg4[%c0_7, %c0_8], %11 {strides = array<i32>} : memref<8x8xf32, #tpu.memory_space<vmem>>, vector<8x8xf32>,
    return
  }
  func.func @transform_0(%arg0: i32) -> (i32, i32) {
    %c0_i32 = arith.constant 0 : i32
    %c0_i32_0 = arith.constant 0 : i32
    %c0_i32_1 = arith.constant 0 : i32
    return %c0_i32, %c0_i32_0 : i32, i32
  }
  func.func @transform_1(%arg0: i32) -> (i32, i32) {
    %c0_i32 = arith.constant 0 : i32
    %c0_i32_0 = arith.constant 0 : i32
    %c0_i32_1 = arith.constant 0 : i32
    return %c0_i32, %c0_i32_0 : i32, i32
  }
  func.func @transform_2(%arg0: i32) -> (i32, i32) {
    %c0_i32 = arith.constant 0 : i32
    %c0_i32_0 = arith.constant 0 : i32
    %c0_i32_1 = arith.constant 0 : i32
    return %c0_i32, %c0_i32_0 : i32, i32
  }
  func.func @transform_3(%arg0: i32) -> (i32, i32) {
    %c0_i32 = arith.constant 0 : i32
    %c0_i32_0 = arith.constant 0 : i32
    %c0_i32_1 = arith.constant 0 : i32
    return %c0_i32, %c0_i32_0 : i32, i32
  }
}

</mosaic_0001>

<bundles_post_ra>
// kernel: contrastive_future_state_forward.2
= control target key start
LH: loop header
LB: loop body
LE: loop exit
PB: predicated region body
PF: predicated region fallthrough
CT: control target
= control target key end

     0   :  { %vm42_vm0 = vcmask 130048   ;;  %s437_s1 = inlined_call_operand.vmem [shape: bf16[16,128], index: 1, kind: input, shape index: {}]   ;;  %s438_s0 = inlined_call_operand.vmem [shape: f32[16,16], index: 0, kind: input, shape index: {}]   ;;  %s439_s3 = inlined_call_operand.vmem [shape: bf16[128,128], index: 3, kind: input, shape index: {}]   ;;  %s440_s2 = inlined_call_operand.vmem [shape: f32[1,128], index: 2, kind: input, shape index: {}]   ;;  %s441_s4 = inlined_call_operand.vmem [shape: f32[1,128], index: 4, kind: input, shape index: {}]   ;;  %s442_s5 = inlined_call_operand.vmem [shape: bf16[128,128], index: 5, kind: input, shape index: {}]   ;;  %s443_s6 = inlined_call_operand.vmem [shape: f32[1,128], index: 6, kind: input, shape index: {}]   ;;  %s444_s7 = inlined_call_operand.vmem [shape: f32[16,128], index: 7, kind: output, shape index: {}]  }
   0x1   :  { %v305_v0 = vld [vmem:[%s437_s1] sm:$0xff]  ;;  %v28_v2 = vld [vmem:[%s438_s0 + $0x8] sm:$0xff]  ;;  %v313_v4 = vld [vmem:[%s439_s3 + $0x38] sm:$0xff] }
   0x2   :  { %v27_v1 = vld [vmem:[%s438_s0] sm:$0xff]  ;;  %53 = vmatpush.bf16.msra.mxu0 %v305_v0  ;;  %131 = vmatpush.bf16.msra.mxu1 %v313_v4  ;;  %v312_v5 = vld [vmem:[%s439_s3 + $0x30] sm:$0xff]  ;;  %v311_v6 = vld [vmem:[%s439_s3 + $0x28] sm:$0xff] }
   0x3   :  { %v29_v3 = vpack.c.bf16 %v28_v2, %v27_v1  ;;  %v310_v7 = vld [vmem:[%s439_s3 + $0x20] sm:$0xff]  ;;  %v309_v8 = vld [vmem:[%s439_s3 + $0x18] sm:$0xff]  ;;  %v308_v9 = vld [vmem:[%s439_s3 + $0x10] sm:$0xff] }
   0x4   :  { %v307_v10 = vld [vmem:[%s439_s3 + $0x8] sm:$0xff]  ;;  %v306_v11 = vld [vmem:[%s439_s3] sm:$0xff]  ;;  %v321_v12 = vld [vmem:[%s442_s5 + $0x38] sm:$0xff] }
   0x5   :  { %240 = vmatmul.msk.bf16.vlgmr.msra.gmra.mxu0 %vm42_vm0, %v29_v3  ;;  %216 = vmatpush.bf16.msra.mxu2 %v321_v12  ;;  %v320_v13 = vld [vmem:[%s442_s5 + $0x30] sm:$0xff]  ;;  %v319_v14 = vld [vmem:[%s442_s5 + $0x28] sm:$0xff]  ;;  %v318_v15 = vld [vmem:[%s442_s5 + $0x20] sm:$0xff] }
   0x6   :  { %132 = vmatpush.bf16.msra.mxu1 %v312_v5  ;;  %v322_v17 = vld [vmem:[%s440_s2] ss:$0 sm:$0xff]  ;;  %v317_v24 = vld [vmem:[%s442_s5 + $0x18] sm:$0xff]  ;;  %v316_v25 = vld [vmem:[%s442_s5 + $0x10] sm:$0xff] }
   0x7   :  { %v315_v26 = vld [vmem:[%s442_s5 + $0x8] sm:$0xff]  ;;  %v314_v27 = vld [vmem:[%s442_s5] sm:$0xff] }
   0x8   :  { %v323_v29 = vld [vmem:[%s441_s4] ss:$0 sm:$0xff] }
   0x9   :  { %217 = vmatpush.bf16.msra.mxu2 %v320_v13  ;;  %v324_v36 = vld [vmem:[%s443_s6] ss:$0 sm:$0xff] }
   0xa   :  { %133 = vmatpush.bf16.msra.mxu1 %v311_v6 }
   0xd   :  { %218 = vmatpush.bf16.msra.mxu2 %v319_v14 }
   0xe   :  { %134 = vmatpush.bf16.msra.mxu1 %v310_v7 }
  0x11   :  { %219 = vmatpush.bf16.msra.mxu2 %v318_v15 }
  0x12   :  { %135 = vmatpush.bf16.msra.mxu1 %v309_v8 }
  0x15   :  { %220 = vmatpush.bf16.msra.mxu2 %v317_v24 }
  0x16   :  { %136 = vmatpush.bf16.msra.mxu1 %v308_v9 }
  0x19   :  { %221 = vmatpush.bf16.msra.mxu2 %v316_v25 }
  0x1a   :  { %137 = vmatpush.bf16.msra.mxu1 %v307_v10 }
  0x1d   :  { %222 = vmatpush.bf16.msra.mxu2 %v315_v26 }
  0x1e   :  { %138 = vmatpush.bf16.msra.mxu1 %v306_v11 }
  0x21   :  { %223 = vmatpush.bf16.msra.mxu2 %v314_v27 }
  0x82   :  { %v55_v16 = vpop.f32.mrf.mxu0 }
  0x83   :  { %v56_v18 = vadd.f32 %v322_v17, %v55_v16 }
  0x85   :  { %v60_v21 = vmax.f32 %v56_v18, 0.0 }
  0x8a   :  { %v57_v19 = vpop.f32.mrf.mxu0 }
  0x8b   :  { %v58_v20 = vadd.f32 %v322_v17, %v57_v19 }
  0x8d   :  { %v61_v22 = vmax.f32 %v58_v20, 0.0 }
  0x8f   :  { %v62_v23 = vpack.c.bf16 %v61_v22, %v60_v21 }
  0x91   :  { %139 = vmatmul.bf16.vlgmr.msra.gmra.mxu1 %v62_v23 }
 0x10e   :  { %v140_v28 = vpop.f32.mrf.mxu1 }
 0x10f   :  { %v141_v30 = vadd.f32 %v323_v29, %v140_v28 }
 0x111   :  { %v145_v33 = vmax.f32 %v141_v30, 0.0 }
 0x116   :  { %v142_v31 = vpop.f32.mrf.mxu1 }
 0x117   :  { %v143_v32 = vadd.f32 %v323_v29, %v142_v31 }
 0x119   :  { %v146_v34 = vmax.f32 %v143_v32, 0.0 }
 0x11b   :  { %v147_v35 = vpack.c.bf16 %v146_v34, %v145_v33 }
 0x11d   :  { %224 = vmatmul.bf16.vlgmr.msra.gmra.mxu2 %v147_v35 }
 0x1a0   :  { %v225_v37 = vpop.f32.mrf.mxu2 }
 0x1a1   :  { %v226_v38 = vadd.f32 %v324_v36, %v225_v37 }
 0x1a3   :  { %230 = vst [vmem:[%s444_s7] sm:$0xff] %v226_v38 }
 0x1a8   :  { %v227_v39 = vpop.f32.mrf.mxu2 }
 0x1a9   :  { %v228_v40 = vadd.f32 %v324_v36, %v227_v39 }
 0x1ab   :  { %231 = vst [vmem:[%s444_s7 + $0x8] sm:$0xff] %v228_v40 }

// kernel: contrastive_future_state_forward.3
= control target key start
LH: loop header
LB: loop body
LE: loop exit
PB: predicated region body
PF: predicated region fallthrough
CT: control target
= control target key end

     0   :  { %s254_s0 = inlined_call_operand.vmem [shape: f32[8,128], index: 0, kind: input, shape index: {}]   ;;  %s255_s1 = inlined_call_operand.vmem [shape: f32[8,128], index: 1, kind: input, shape index: {}]   ;;  %s256_s2 = inlined_call_operand.vmem [shape: bf16[128,128], index: 2, kind: input, shape index: {}]   ;;  %s257_s3 = inlined_call_operand.hbm [shape: f32[8,8], index: 3, kind: output, shape index: {}]  }
   0x1   :  { %v172_v0 = vld [vmem:[%s256_s2 + $0x38] sm:$0xff]  ;;  %v171_v1 = vld [vmem:[%s256_s2 + $0x30] sm:$0xff]  ;;  %v18_v2 = vld [vmem:[%s255_s1] sm:$0xff] }
   0x2   :  { %84 = vmatpush.bf16.msra.mxu0 %v172_v0 }
   0x3   :  { %8 = vsyncpa [#allocation3], 0  ;;  %v19_v3 = vpack.c.bf16 %v18_v2, %v18_v2  ;;  %v170_v4 = vld [vmem:[%s256_s2 + $0x28] sm:$0xff]  ;;  %v169_v5 = vld [vmem:[%s256_s2 + $0x20] sm:$0xff]  ;;  %vm111_vm0 = vcmask 64512   ;;  %s200_s4 = smov [#allocation2]  }
   0x4   :  { %v168_v6 = vld [vmem:[%s256_s2 + $0x18] sm:$0xff]  ;;  %v167_v7 = vld [vmem:[%s256_s2 + $0x10] sm:$0xff]  ;;  %v166_v8 = vld [vmem:[%s256_s2 + $0x8] sm:$0xff]  ;;  %s122_s5 = sshll.u32 %s200_s4, 4  ;;  %s124_s7 = sshll.u32 %s257_s3, 4  ;;  %s123_s5 = int_to_ptr.vmem [resolvable:$true] %s122_s5  ;;  %s125_s7 = int_to_ptr.hbm [resolvable:$true] %s124_s7 }
   0x5   :  { %105 = vmatpush.bf16.xpose.msra.mxu1 %v19_v3  ;;  %v165_v9 = vld [vmem:[%s256_s2] sm:$0xff] }
   0x6   :  { %85 = vmatpush.bf16.msra.mxu0 %v171_v1  ;;  %v16_v10 = vld [vmem:[%s254_s0] sm:$0xff] }
   0x7   :  { %v17_v11 = vpack.c.bf16 %v16_v10, %v16_v10 }
   0xa   :  { %86 = vmatpush.bf16.msra.mxu0 %v170_v4 }
   0xe   :  { %87 = vmatpush.bf16.msra.mxu0 %v169_v5 }
  0x12   :  { %88 = vmatpush.bf16.msra.mxu0 %v168_v6 }
  0x16   :  { %89 = vmatpush.bf16.msra.mxu0 %v167_v7 }
  0x1a   :  { %90 = vmatpush.bf16.msra.mxu0 %v166_v8 }
  0x1e   :  { %91 = vmatpush.bf16.msra.mxu0 %v165_v9 }
  0x21   :  { %92 = vmatmul.bf16.vlgmr.msra.gmra.mxu0 %v17_v11 }
  0x9e   :  { %v93_v12 = vpop.f32.mrf.mxu0 }
  0x9f   :  { %v97_v13 = vpack.c.bf16 %v93_v12, %v93_v12 }
  0xa1   :  { %106 = vmatmul.bf16.vlgmr.msra.gmra.mxu1 %v97_v13 }
  0xa6   :  { %v95_v14 = vpop.f32.mrf.mxu0 }
 0x11e   :  { %v107_v15 = vpop.f32.mrf.mxu1 }
 0x11f   :  { %v112_v16 = vsel %vm111_vm0, %v107_v15, -inf }
 0x120   :  { %113 = vmax.xlane.f32.xlu0 %v112_v16 }
 0x126   :  { %v109_v17 = vpop.f32.mrf.mxu1 }
 0x193   :  { %v114_v18 = vpop.xlane.xlu0 %113 }
 0x194   :  { %v115_v19 = vsub.f32 %v107_v15, %v114_v18 }
 0x196   :  { %116 = vst.msk [vmem:[#allocation2] sm:$0xff] %vm111_vm0, %v115_v19 }
 0x197   :  { %127 = dma.vmem_to_hbm [thread:$0]  %s123_s5, 128, %s125_s7, [#allocation3]  }
 0x198   :  { %198 = dma.done.wait [#allocation3], 128  }
 0x199   :  { %199 = vsyncadd [#allocation3], 4294967168 }
 0x19a   :  { %132 = vsyncpa [#allocation3], 1 }

</bundles_post_ra>
